<compile_context>
chip_gen: v7x
topology: tpu7x:2x2x1
jax: 0.10.0
libtpu: 0.0.40
codegen_flags: <defaults>
</compile_context>

<pallas_src>
import jax
import jax.numpy as jnp
from jax import lax
from jax.experimental import pallas as pl
from jax.experimental.pallas import tpu as pltpu


def _round_up(x, m):
    return (x + m - 1) // m * m


def _make_cosplace_kernel(p_int, true_hw, hw_pad):
    """Build the fused kernel.

    p_int: static integer GeM power (fast VPU-multiply path) or None for a
           runtime p delivered through SMEM (EUP exp/log path).
    """

    def compute(x_ref, w_ref, b_ref, o_ref, p_dyn):
        # x_ref: (TB, Cp, HWp) f32   w_ref: (Cp, Dp) f32   b_ref: (1, Dp) f32
        # o_ref: (TB, Dp) f32
        x = x_ref[...]

        # --- F.normalize(x, p=2, dim=1): L2 over channels.
        # rsqrt on the small (TB,1,HWp) operand, then a full-size multiply
        # (identical to x / max(sqrt(sumsq), 1e-12)).
        sumsq = jnp.sum(x * x, axis=1, keepdims=True)                # (TB,1,HWp)
        xn = x * lax.rsqrt(jnp.maximum(sumsq, 1e-24))

        # --- GeM: clamp(min=1e-6)^p, full-spatial mean, ^(1/p) ---
        xc = jnp.maximum(xn, 1e-6)
        if p_int is not None:
            xp = xc                                                   # x^p via VPU muls
            for _ in range(p_int - 1):
                xp = xp * xc
            inv_p = 1.0 / float(p_int)
        else:
            xp = jnp.exp(p_dyn * jnp.log(xc))                         # xc > 0
            inv_p = 1.0 / p_dyn

        if hw_pad != true_hw:
            # exclude padded spatial lanes from the mean
            lane = lax.broadcasted_iota(jnp.int32, xp.shape, 2)
            xp = jnp.where(lane < true_hw, xp, 0.0)
        g = jnp.sum(xp, axis=-1) * (1.0 / float(true_hw))             # (TB, Cp)
        g = jnp.exp(jnp.log(g) * inv_p)                               # g > 0, tiny tensor

        # --- nn.Linear: y = g @ W^T + b (MXU, f32 accumulation) ---
        y = jnp.dot(g, w_ref[...], preferred_element_type=jnp.float32) + b_ref[...]

        # --- F.normalize(y, p=2, dim=1) ---
        osum = jnp.sum(y * y, axis=-1, keepdims=True)                 # (TB, 1)
        o_ref[...] = y * lax.rsqrt(jnp.maximum(osum, 1e-24))

    if p_int is not None:
        def kernel(x_ref, w_ref, b_ref, o_ref):
            compute(x_ref, w_ref, b_ref, o_ref, None)
    else:
        def kernel(p_ref, x_ref, w_ref, b_ref, o_ref):
            compute(x_ref, w_ref, b_ref, o_ref, p_ref[0])
    return kernel


def cosplace_forward(x_nchw, fc_weight, fc_bias, gem_p):
    """x_nchw: (B, C, H, W); fc_weight: (out_dim, C); fc_bias: (out_dim,); gem_p: scalar."""
    B, C, H, W = x_nchw.shape
    D = fc_weight.shape[0]
    HW = H * W

    # lane-/sublane-dense padded shapes
    HW_pad = _round_up(HW, 128)
    D_pad = _round_up(D, 128)
    C_pad = _round_up(C, 8)

    # Static-integer GeM power fast path (CosPlace default p=3). If gem_p is a
    # tracer (e.g. learnable p under jit), fall back to the runtime-p kernel.
    p_int = None
    try:
        p_val = float(gem_p)
        if abs(p_val - round(p_val)) < 1e-12 and 1 <= int(round(p_val)) <= 16:
            p_int = int(round(p_val))
    except Exception:
        p_int = None

    # Batch tile: multiple of 8, sized so the double-buffered x tile stays
    # around ~16 MiB total (safe for v7x's 64 MiB physical VMEM).
    x_row_bytes = C_pad * HW_pad * 4
    tb = max(8, min(128, ((8 << 20) // max(x_row_bytes, 1)) // 8 * 8))
    tb = min(tb, _round_up(B, 8))
    B_pad = _round_up(B, tb)
    grid = (B_pad // tb,)

    # Padding / reshape (pure layout glue, no compute). Zero-padded channels /
    # batch rows / output columns are mathematically inert for this forward.
    x = jnp.zeros((B_pad, C_pad, HW_pad), jnp.float32)
    x = x.at[:B, :C, :HW].set(x_nchw.reshape(B, C, HW).astype(jnp.float32))
    w_t = jnp.zeros((C_pad, D_pad), jnp.float32)
    w_t = w_t.at[:C, :D].set(jnp.transpose(fc_weight).astype(jnp.float32))
    b2 = jnp.zeros((1, D_pad), jnp.float32).at[0, :D].set(fc_bias.astype(jnp.float32))

    # VMEM budget: double-buffered x tile + elementwise temps + resident W/bias
    # + double-buffered output tile (generous headroom, capped for v7x).
    x_tile = tb * x_row_bytes
    est = 5 * x_tile + C_pad * D_pad * 4 + D_pad * 4 + 2 * tb * D_pad * 4
    vmem_limit = int(min(max(3 * est, 16 << 20), 48 << 20))

    kernel = _make_cosplace_kernel(p_int, HW, HW_pad)

    in_specs = [
        pl.BlockSpec((tb, C_pad, HW_pad), lambda b: (b, 0, 0)),   # x: batch-tiled
        pl.BlockSpec((C_pad, D_pad), lambda b: (0, 0)),           # W^T: VMEM-resident
        pl.BlockSpec((1, D_pad), lambda b: (0, 0)),               # bias: VMEM-resident
    ]
    args = [x, w_t, b2]
    if p_int is None:
        # runtime p lives on the scalar path (SMEM)
        in_specs = [pl.BlockSpec(memory_space=pltpu.MemorySpace.SMEM)] + in_specs
        args = [jnp.asarray(gem_p, jnp.float32).reshape(1)] + args

    # NOTE: for extremely large feature maps one could add an inner "arbitrary"
    # grid axis over HW with a (TB, C) accumulator (P3 pattern); typical
    # backbone HW (<= a few hundred after padding) fits comfortably per tile.
    out = pl.pallas_call(
        kernel,
        out_shape=jax.ShapeDtypeStruct((B_pad, D_pad), jnp.float32),
        grid=grid,
        in_specs=in_specs,
        out_specs=pl.BlockSpec((tb, D_pad), lambda b: (b, 0)),
        compiler_params=pltpu.CompilerParams(
            dimension_semantics=("parallel",),
            vmem_limit_bytes=vmem_limit,
        ),
    )(*args)

    return out[:B, :D]


def cosplace_reference(x_nchw, fc_weight, fc_bias, gem_p):
    """Pure-JAX reference mirroring the PyTorch module."""
    x = x_nchw.astype(jnp.float32)
    x = x / jnp.maximum(jnp.linalg.norm(x, axis=1, keepdims=True), 1e-12)
    x = jnp.mean(jnp.maximum(x, 1e-6) ** gem_p, axis=(2, 3)) ** (1.0 / gem_p)
    y = x @ fc_weight.T + fc_bias
    y = y / jnp.maximum(jnp.linalg.norm(y, axis=1, keepdims=True), 1e-12)
    return y


if __name__ == "__main__":
    B, C, H, W = 2, 4, 16, 16       # NCHW input, in_dim = C
    out_dim = 32

    key = jax.random.PRNGKey(0)
    kx, kw, kb = jax.random.split(key, 3)
    x = jax.random.normal(kx, (B, C, H, W), dtype=jnp.float32)

    # Deterministic synthetic parameters (nn.Linear(in_dim, out_dim), GeM(p=3))
    fc_weight = jax.random.normal(kw, (out_dim, C), dtype=jnp.float32) * 0.1
    fc_bias = jax.random.normal(kb, (out_dim,), dtype=jnp.float32) * 0.01
    gem_p = 3.0                     # CosPlace default GeM power

    ref = cosplace_reference(x, fc_weight, fc_bias, jnp.float32(gem_p))

    # static-integer-p path (VPU pow-by-multiply)
    out = jax.block_until_ready(cosplace_forward(x, fc_weight, fc_bias, gem_p))
    assert out.shape == (B, out_dim)
    assert jnp.allclose(out, ref, atol=1e-5, rtol=1e-5), "static-p mismatch vs reference"

    # runtime-p path (p traced under jit -> SMEM scalar + exp/log GeM)
    out_dyn = jax.block_until_ready(
        jax.jit(cosplace_forward)(x, fc_weight, fc_bias, jnp.float32(gem_p)))
    assert out_dyn.shape == (B, out_dim)
    assert jnp.allclose(out_dyn, ref, atol=1e-5, rtol=1e-5), "runtime-p mismatch vs reference"

    print("KERNEL_OK")
</pallas_src>

<mosaic_0001>
module attributes {stable_mosaic.version = 11 : i64} {
  func.func @kernel(%arg0: i32, %arg1: memref<8x8x256xf32, #tpu.memory_space<vmem>>, %arg2: memref<8x128xf32, #tpu.memory_space<vmem>>, %arg3: memref<1x128xf32, #tpu.memory_space<vmem>>, %arg4: memref<8x128xf32, #tpu.memory_space<vmem>>) attributes {dimension_semantics = [#tpu.dimension_semantics<parallel>], iteration_bounds = array<i64: 1>, scalar_prefetch = 0 : i64, scratch_operands = 0 : i64, tpu.core_type = #tpu.core_type<tc>, window_params = [{transform_indices = @transform_0, window_bounds = array<i64: 8, 8, 256>}, {pipeline_mode = #tpu.pipeline_mode<synchronous>, transform_indices = @transform_1, window_bounds = array<i64: 8, 128>}, {pipeline_mode = #tpu.pipeline_mode<synchronous>, transform_indices = @transform_2, window_bounds = array<i64: 1, 128>}, {transform_indices = @transform_3, window_bounds = array<i64: 8, 128>}]} {
    %c0 = arith.constant 0 : index
    %c0_0 = arith.constant 0 : index
    %c0_1 = arith.constant 0 : index
    %0 = vector.load %arg1[%c0, %c0_0, %c0_1] : memref<8x8x256xf32, #tpu.memory_space<vmem>>, vector<8x8x256xf32>
    %1 = arith.mulf %0, %0 : vector<8x8x256xf32>
    %cst = arith.constant dense<0.000000e+00> : vector<8x256xf32>
    %2 = vector.multi_reduction <add>, %1, %cst [1] : vector<8x8x256xf32> to vector<8x256xf32>
    %3 = vector.shape_cast %2 : vector<8x256xf32> to vector<8x1x256xf32>
    %cst_2 = arith.constant 1.000000e-24 : f32
    %4 = vector.broadcast %cst_2 : f32 to vector<8x1x256xf32>
    %5 = arith.maximumf %3, %4 : vector<8x1x256xf32>
    %6 = math.rsqrt %5 : vector<8x1x256xf32>
    %7 = vector.broadcast %6 : vector<8x1x256xf32> to vector<8x8x256xf32>
    %8 = arith.mulf %0, %7 : vector<8x8x256xf32>
    %cst_3 = arith.constant 9.99999997E-7 : f32
    %9 = vector.broadcast %cst_3 : f32 to vector<8x8x256xf32>
    %10 = arith.maximumf %8, %9 : vector<8x8x256xf32>
    %11 = arith.mulf %10, %10 : vector<8x8x256xf32>
    %12 = arith.mulf %11, %10 : vector<8x8x256xf32>
    %cst_4 = arith.constant dense<0.000000e+00> : vector<8x8xf32>
    %13 = vector.multi_reduction <add>, %12, %cst_4 [2] : vector<8x8x256xf32> to vector<8x8xf32>
    %cst_5 = arith.constant 3.906250e-03 : f32
    %14 = vector.broadcast %cst_5 : f32 to vector<8x8xf32>
    %15 = arith.mulf %13, %14 : vector<8x8xf32>
    %16 = math.log %15 : vector<8x8xf32>
    %cst_6 = arith.constant 0.333333343 : f32
    %17 = vector.broadcast %cst_6 : f32 to vector<8x8xf32>
    %18 = arith.mulf %16, %17 : vector<8x8xf32>
    %19 = math.exp %18 : vector<8x8xf32>
    %c0_7 = arith.constant 0 : index
    %c0_8 = arith.constant 0 : index
    %20 = vector.load %arg2[%c0_7, %c0_8] : memref<8x128xf32, #tpu.memory_space<vmem>>, vector<8x128xf32>
    %cst_9 = arith.constant dense<0.000000e+00> : vector<8x128xf32>
    %21 = tpu.matmul %19, %20, %cst_9 {dimension_numbers = #tpu.dot_dimension_numbers<[1], [0], [0], [1], [0, 0, 1, 1], [], []>} : vector<8x8xf32>, vector<8x128xf32>, vector<8x128xf32> -> vector<8x128xf32>
    %c0_10 = arith.constant 0 : index
    %c0_11 = arith.constant 0 : index
    %22 = vector.load %arg3[%c0_10, %c0_11] : memref<1x128xf32, #tpu.memory_space<vmem>>, vector<1x128xf32>
    %23 = vector.broadcast %22 : vector<1x128xf32> to vector<8x128xf32>
    %24 = arith.addf %21, %23 : vector<8x128xf32>
    %25 = arith.mulf %24, %24 : vector<8x128xf32>
    %cst_12 = arith.constant dense<0.000000e+00> : vector<8xf32>
    %26 = vector.multi_reduction <add>, %25, %cst_12 [1] : vector<8x128xf32> to vector<8xf32>
    %27 = vector.shape_cast %26 : vector<8xf32> to vector<8x1xf32>
    %cst_13 = arith.constant 1.000000e-24 : f32
    %28 = vector.broadcast %cst_13 : f32 to vector<8x1xf32>
    %29 = arith.maximumf %27, %28 : vector<8x1xf32>
    %30 = math.rsqrt %29 : vector<8x1xf32>
    %31 = vector.broadcast %30 : vector<8x1xf32> to vector<8x128xf32>
    %32 = arith.mulf %24, %31 : vector<8x128xf32>
    %c0_14 = arith.constant 0 : index
    %c0_15 = arith.constant 0 : index
    %33 = vector.load %arg4[%c0_14, %c0_15] : memref<8x128xf32, #tpu.memory_space<vmem>>, vector<8x128xf32>
    tpu.vector_store %arg4[%c0_14, %c0_15], %32 {strides = array<i32>} : memref<8x128xf32, #tpu.memory_space<vmem>>, vector<8x128xf32>,
    return
  }
  func.func @transform_0(%arg0: i32) -> (i32, i32, i32) {
    %c0_i32 = arith.constant 0 : i32
    %c0_i32_0 = arith.constant 0 : i32
    %c0_i32_1 = arith.constant 0 : i32
    return %arg0, %c0_i32, %c0_i32_0 : i32, i32, i32
  }
  func.func @transform_1(%arg0: i32) -> (i32, i32) {
    %c0_i32 = arith.constant 0 : i32
    %c0_i32_0 = arith.constant 0 : i32
    %c0_i32_1 = arith.constant 0 : i32
    return %c0_i32, %c0_i32_0 : i32, i32
  }
  func.func @transform_2(%arg0: i32) -> (i32, i32) {
    %c0_i32 = arith.constant 0 : i32
    %c0_i32_0 = arith.constant 0 : i32
    %c0_i32_1 = arith.constant 0 : i32
    return %c0_i32, %c0_i32_0 : i32, i32
  }
  func.func @transform_3(%arg0: i32) -> (i32, i32) {
    %c0_i32 = arith.constant 0 : i32
    %c0_i32_0 = arith.constant 0 : i32
    return %arg0, %c0_i32 : i32, i32
  }
}

</mosaic_0001>

<bundles_post_ra>
// kernel: tpu_custom_call.1
= control target key start
LH: loop header
LB: loop body
LE: loop exit
PB: predicated region body
PF: predicated region fallthrough
CT: control target
= control target key end

     0   :  { %8 = vsyncpa [#allocation3], 0  ;;  %s805_s0 = inlined_call_operand.hbm [shape: f32[8,8,256], index: 0, kind: input, shape index: {}]   ;;  %s806_s1 = inlined_call_operand.hbm [shape: f32[8,128], index: 1, kind: input, shape index: {}]   ;;  %s807_s2 = inlined_call_operand.vmem [shape: f32[1,128], index: 2, kind: input, shape index: {}]   ;;  %s808_s3 = inlined_call_operand.hbm [shape: f32[8,128], index: 3, kind: output, shape index: {}]  }
   0x1   :  { %9 = vsyncpa [#allocation6], 0 }
   0x2   :  { %10 = vsyncpa [#allocation4], 0  ;;  %s651_s12 = smov [#allocation2]   ;;  %s579_s16 = scalar_lea.hbm %s805_s0, 2048 }
   0x3   :  { %s16_s13 = sshll.u32 %s651_s12, 4  ;;  %p580_p0 = scmp.ne.s32.totalorder %s805_s0, %s579_s16  ;;  %s17_s13 = int_to_ptr.vmem [resolvable:$true] %s16_s13 }
   0x4   :  { %p583_p1 = scmp.lt.u32.totalorder %s579_s16, %s805_s0 }
   0x6   :  { %p585_p2 = pnand %p583_p1, %p580_p0 }
   0x8   :  { %588 = shalt.err (!%p585_p2)
}
   0x9   :  { %s589_s21 = scalar_lea.vmem %s17_s13, 2048  ;;  %p594_p4 = scmp.lt.s32.totalorder %s17_s13, %s17_s13 }
   0xa   :  { %p590_p3 = scmp.ne.s32.totalorder %s17_s13, %s589_s21  ;;  %p595_p5 = scmp.lt.s32.totalorder %s589_s21, %s589_s21 }
   0xc   :  { %p596_p6 = por %p595_p5, %p594_p4 }
   0xe   :  { %p597_p7 = pnand %p596_p6, %p590_p3 }
  0x10   :  { %600 = shalt.err (!%p597_p7)
}
  0x11   :  { %s652_s22 = smov 256   ;;  %s653_s23 = smov 16  }
  0x12   :  { %22 = dma.hbm_to_vmem [thread:$0]  %s805_s0, 2048, %s17_s13, [#allocation3], %s652_s22, %s652_s22, %s653_s23  }
  0x13   :  { %s654_s26 = smov [#allocation5]   ;;  %s601_s30 = scalar_lea.hbm %s806_s1, 128 }
  0x14   :  { %s29_s27 = sshll.u32 %s654_s26, 4  ;;  %p602_p8 = scmp.ne.s32.totalorder %s806_s1, %s601_s30  ;;  %s30_s27 = int_to_ptr.vmem [resolvable:$true] %s29_s27 }
  0x15   :  { %p605_p9 = scmp.lt.u32.totalorder %s601_s30, %s806_s1 }
  0x17   :  { %p607_p10 = pnand %p605_p9, %p602_p8 }
  0x19   :  { %610 = shalt.err (!%p607_p10)
}
  0x1a   :  { %s611_s8 = scalar_lea.vmem %s30_s27, 128  ;;  %p616_p12 = scmp.lt.s32.totalorder %s30_s27, %s30_s27 }
  0x1b   :  { %p612_p11 = scmp.ne.s32.totalorder %s30_s27, %s611_s8  ;;  %p617_p13 = scmp.lt.s32.totalorder %s611_s8, %s611_s8 }
  0x1d   :  { %p618_p0 = por %p617_p13, %p616_p12 }
  0x1f   :  { %p619_p1 = pnand %p618_p0, %p612_p11 }
  0x21   :  { %622 = shalt.err (!%p619_p1)
}
  0x22   :  { %32 = dma.hbm_to_vmem [thread:$0]  %s806_s1, 128, %s30_s27, [#allocation6]  }
  0x23   :  { %645 = dma.done.wait [#allocation3], 2048  }
  0x24   :  { %646 = vsyncadd [#allocation3], 4294965248 }
  0x25   :  { %647 = dma.done.wait [#allocation6], 128  }
  0x26   :  { %648 = vsyncadd [#allocation6], 4294967168  ;;  %v702_v0 = vld [vmem:[#allocation2] sm:$0xff]  ;;  %v704_v1 = vld [vmem:[#allocation2 + $0x8] sm:$0xff]  ;;  %vm656_vm0 = vmmov 0   ;;  %vm387_vm1 = vcmask 1041409  }
  0x27   :  { %v706_v2 = vld [vmem:[#allocation2 + $0x20] sm:$0xff]  ;;  %v57_v3 = vmul.f32 %v702_v0, %v702_v0  ;;  %v58_v4 = vmul.f32 %v704_v1, %v704_v1  ;;  %v712_v5 = vld [vmem:[#allocation2 + $0x28] sm:$0xff]  ;;  %v716_v7 = vld [vmem:[#allocation2 + $0x10] sm:$0xff]  ;;  %vm389_vm2 = vcmask 1042434   ;;  %vm391_vm3 = vcmask 1043459   ;;  %s657_s11 = smov [#allocation7]  }
  0x28   :  { %v61_v6 = vmul.f32 %v706_v2, %v706_v2  ;;  %v718_v8 = vld [vmem:[#allocation2 + $0x18] sm:$0xff]  ;;  %v62_v9 = vmul.f32 %v712_v5, %v712_v5  ;;  %v59_v10 = vmul.f32 %v716_v7, %v716_v7  ;;  %v726_v12 = vld [vmem:[#allocation2 + $0x30] sm:$0xff]  ;;  %v734_v58 = vld [vmem:[#allocation2 + $0x40] sm:$0xff]  ;;  %vm393_vm4 = vcmask 1044484   ;;  %s487_s12 = sshll.u32 %s657_s11, 4  ;;  %s488_s12 = int_to_ptr.vmem [resolvable:$true] %s487_s12 }
  0x29   :  { %v60_v11 = vmul.f32 %v718_v8, %v718_v8  ;;  %v728_v13 = vld [vmem:[#allocation2 + $0x38] sm:$0xff]  ;;  %v73_v14 = vrot.slane %v57_v3, 4  ;;  %v79_v15 = vrot.slane %v58_v4, 4  ;;  %v63_v17 = vmul.f32 %v726_v12, %v726_v12  ;;  %v736_v59 = vld [vmem:[#allocation2 + $0x48] sm:$0xff]  ;;  %s623_s13 = scalar_lea.vmem %s488_s12, 128  ;;  %p628_p3 = scmp.lt.s32.totalorder %s488_s12, %s488_s12 }
  0x2a   :  { %v97_v16 = vrot.slane %v61_v6, 4  ;;  %v103_v18 = vrot.slane %v62_v9, 4  ;;  %v85_v19 = vrot.slane %v59_v10, 4  ;;  %v64_v21 = vmul.f32 %v728_v13, %v728_v13  ;;  %p624_p2 = scmp.ne.s32.totalorder %s488_s12, %s623_s13  ;;  %p629_p4 = scmp.lt.s32.totalorder %s623_s13, %s623_s13 }
  0x2b   :  { %v91_v20 = vrot.slane %v60_v11, 4  ;;  %v74_v22 = vadd.f32 %v73_v14, %v57_v3  ;;  %v80_v23 = vadd.f32 %v79_v15, %v58_v4  ;;  %v109_v25 = vrot.slane %v63_v17, 4  ;;  %v738_v3 = vld [vmem:[#allocation2 + $0x50] sm:$0xff]  ;;  %v740_v4 = vld [vmem:[#allocation2 + $0x58] sm:$0xff] }
  0x2c   :  { %v98_v24 = vadd.f32 %v97_v16, %v61_v6  ;;  %v104_v26 = vadd.f32 %v103_v18, %v62_v9  ;;  %v86_v27 = vadd.f32 %v85_v19, %v59_v10  ;;  %v115_v29 = vrot.slane %v64_v21, 4  ;;  %v742_v6 = vld [vmem:[#allocation2 + $0x60] sm:$0xff]  ;;  %p630_p5 = por %p629_p4, %p628_p3 }
  0x2d   :  { %v92_v28 = vadd.f32 %v91_v20, %v60_v11  ;;  %v75_v30 = vrot.slane %v74_v22, 2  ;;  %v81_v31 = vrot.slane %v80_v23, 2  ;;  %v110_v33 = vadd.f32 %v109_v25, %v63_v17 }
  0x2e   :  { %v99_v32 = vrot.slane %v98_v24, 2  ;;  %v105_v34 = vrot.slane %v104_v26, 2  ;;  %v87_v35 = vrot.slane %v86_v27, 2  ;;  %v116_v37 = vadd.f32 %v115_v29, %v64_v21  ;;  %p631_p6 = pnand %p630_p5, %p624_p2 }
  0x2f   :  { %v93_v36 = vrot.slane %v92_v28, 2  ;;  %v76_v38 = vadd.f32 %v75_v30, %v74_v22  ;;  %v82_v39 = vadd.f32 %v81_v31, %v80_v23  ;;  %v111_v41 = vrot.slane %v110_v33, 2  ;;  %v748_v22 = vld [vmem:[#allocation2 + $0x68] sm:$0xff] }
  0x30   :  { %v100_v40 = vadd.f32 %v99_v32, %v98_v24  ;;  %v106_v42 = vadd.f32 %v105_v34, %v104_v26  ;;  %v88_v43 = vadd.f32 %v87_v35, %v86_v27  ;;  %v117_v45 = vrot.slane %v116_v37, 2 }
  0x31   :  { %v94_v44 = vadd.f32 %v93_v36, %v92_v28  ;;  %v77_v46 = vrot.slane %v76_v38, 1  ;;  %v83_v47 = vrot.slane %v82_v39, 1  ;;  %v112_v49 = vadd.f32 %v111_v41, %v110_v33 }
  0x32   :  { %v101_v48 = vrot.slane %v100_v40, 1  ;;  %v107_v50 = vrot.slane %v106_v42, 1  ;;  %v89_v51 = vrot.slane %v88_v43, 1  ;;  %v118_v53 = vadd.f32 %v117_v45, %v116_v37 }
  0x33   :  { %v95_v52 = vrot.slane %v94_v44, 1  ;;  %v78_v54 = vadd.f32 %v77_v46, %v76_v38  ;;  %v84_v55 = vadd.f32 %v83_v47, %v82_v39  ;;  %v113_v57 = vrot.slane %v112_v49, 1  ;;  %v758_v38 = vld [vmem:[#allocation2 + $0x70] sm:$0xff] }
  0x34   :  { %v102_v56 = vadd.f32 %v101_v48, %v100_v40  ;;  %v108_v60 = vadd.f32 %v107_v50, %v106_v42  ;;  %v90_v61 = vadd.f32 %v89_v51, %v88_v43  ;;  %v119_v63 = vrot.slane %v118_v53, 1  ;;  %v760_v42 = vld [vmem:[#allocation2 + $0x78] sm:$0xff] }
  0x35   :  { %v96_v62 = vadd.f32 %v95_v52, %v94_v44  ;;  %v169_v9 = vmax.f32 %v78_v54, 1e-24  ;;  %v170_v10 = vmax.f32 %v84_v55, 1e-24  ;;  %v114_v14 = vadd.f32 %v113_v57, %v112_v49 }
  0x36   :  { %v173_v11 = vmax.f32 %v102_v56, 1e-24  ;;  %v174_v15 = vmax.f32 %v108_v60, 1e-24  ;;  %v171_v16 = vmax.f32 %v90_v61, 1e-24  ;;  %v120_v18 = vadd.f32 %v119_v63, %v118_v53 }
  0x37   :  { %v172_v17 = vmax.f32 %v96_v62, 1e-24  ;;  %513 = vrsqrt.f32 %v169_v9  ;;  %v175_v19 = vmax.f32 %v114_v14, 1e-24  ;;  %v65_v20 = vmul.f32 %v734_v58, %v734_v58 }
  0x38   :  { %v66_v21 = vmul.f32 %v736_v59, %v736_v59  ;;  %515 = vrsqrt.f32 %v170_v10  ;;  %v176_v23 = vmax.f32 %v120_v18, 1e-24  ;;  %v67_v24 = vmul.f32 %v738_v3, %v738_v3 }
  0x39   :  { %v68_v25 = vmul.f32 %v740_v4, %v740_v4  ;;  %517 = vrsqrt.f32 %v173_v11  ;;  %v121_v26 = vrot.slane %v65_v20, 4  ;;  %v69_v28 = vmul.f32 %v742_v6, %v742_v6 }
  0x3a   :  { %v127_v27 = vrot.slane %v66_v21, 4  ;;  %519 = vrsqrt.f32 %v174_v15  ;;  %v133_v29 = vrot.slane %v67_v24, 4  ;;  %v70_v31 = vmul.f32 %v748_v22, %v748_v22 }
  0x3b   :  { %v139_v30 = vrot.slane %v68_v25, 4  ;;  %521 = vrsqrt.f32 %v171_v16  ;;  %v122_v32 = vadd.f32 %v121_v26, %v65_v20  ;;  %v145_v34 = vrot.slane %v69_v28, 4 }
  0x3c   :  { %v128_v33 = vadd.f32 %v127_v27, %v66_v21  ;;  %523 = vrsqrt.f32 %v172_v17  ;;  %v134_v35 = vadd.f32 %v133_v29, %v67_v24  ;;  %v151_v37 = vrot.slane %v70_v31, 4 }
  0x3d   :  { %v140_v36 = vadd.f32 %v139_v30, %v68_v25  ;;  %525 = vrsqrt.f32 %v175_v19  ;;  %v123_v39 = vrot.slane %v122_v32, 2  ;;  %v146_v41 = vadd.f32 %v145_v34, %v69_v28 }
  0x3e   :  { %v129_v40 = vrot.slane %v128_v33, 2  ;;  %527 = vrsqrt.f32 %v176_v23  ;;  %v135_v43 = vrot.slane %v134_v35, 2  ;;  %v152_v45 = vadd.f32 %v151_v37, %v70_v31 }
  0x3f   :  { %v141_v44 = vrot.slane %v140_v36, 2  ;;  %v124_v46 = vadd.f32 %v123_v39, %v122_v32  ;;  %v147_v48 = vrot.slane %v146_v41, 2  ;;  %v764_v49 = vmul.f32 %v758_v38, %v758_v38 }
  0x40   :  { %v130_v47 = vadd.f32 %v129_v40, %v128_v33  ;;  %v136_v50 = vadd.f32 %v135_v43, %v134_v35  ;;  %v153_v52 = vrot.slane %v152_v45, 2  ;;  %v768_v53 = vmul.f32 %v760_v42, %v760_v42 }
  0x41   :  { %v142_v51 = vadd.f32 %v141_v44, %v140_v36  ;;  %v514_v54 = vpop.eup %513  ;;  %v125_v55 = vrot.slane %v124_v46, 1  ;;  %v148_v57 = vadd.f32 %v147_v48, %v146_v41  ;;  %v157_v60 = vrot.slane %v764_v49, 4 }
  0x42   :  { %v131_v56 = vrot.slane %v130_v47, 1  ;;  %v516_v61 = vpop.eup %515  ;;  %v201_v62 = vmul.f32 %v514_v54, %v702_v0  ;;  %v137_v63 = vrot.slane %v136_v50, 1  ;;  %v154_v10 = vadd.f32 %v153_v52, %v152_v45 }
  0x43   :  { %v143_v9 = vrot.slane %v142_v51, 1  ;;  %v518_v11 = vpop.eup %517  ;;  %v202_v14 = vmul.f32 %v516_v61, %v704_v1  ;;  %v126_v15 = vadd.f32 %v125_v55, %v124_v46  ;;  %v149_v17 = vrot.slane %v148_v57, 1 }
  0x44   :  { %v132_v16 = vadd.f32 %v131_v56, %v130_v47  ;;  %v520_v18 = vpop.eup %519  ;;  %v217_v19 = vmax.f32 %v201_v62, 1e-06  ;;  %v205_v20 = vmul.f32 %v518_v11, %v706_v2  ;;  %v138_v21 = vadd.f32 %v137_v63, %v136_v50 }
  0x45   :  { %v144_v23 = vadd.f32 %v143_v9, %v142_v51  ;;  %v522_v24 = vpop.eup %521  ;;  %v218_v25 = vmax.f32 %v202_v14, 1e-06  ;;  %v206_v26 = vmul.f32 %v520_v18, %v712_v5  ;;  %v177_v0 = vmax.f32 %v126_v15, 1e-24 }
  0x46   :  { %v178_v27 = vmax.f32 %v132_v16, 1e-24  ;;  %v524_v28 = vpop.eup %523  ;;  %v233_v29 = vmul.f32 %v217_v19, %v217_v19  ;;  %v221_v30 = vmax.f32 %v205_v20, 1e-06  ;;  %v203_v1 = vmul.f32 %v522_v24, %v716_v7 }
  0x47   :  { %v179_v31 = vmax.f32 %v138_v21, 1e-24  ;;  %v526_v32 = vpop.eup %525  ;;  %v234_v33 = vmul.f32 %v218_v25, %v218_v25  ;;  %v222_v34 = vmax.f32 %v206_v26, 1e-06  ;;  %v204_v35 = vmul.f32 %v524_v28, %v718_v8 }
  0x48   :  { %529 = vrsqrt.f32 %v177_v0  ;;  %v528_v2 = vpop.eup %527  ;;  %v249_v36 = vmul.f32 %v233_v29, %v217_v19  ;;  %v237_v37 = vmul.f32 %v221_v30, %v221_v30  ;;  %v219_v39 = vmax.f32 %v203_v1, 1e-06 }
  0x49   :  { %v207_v5 = vmul.f32 %v526_v32, %v726_v12  ;;  %v250_v40 = vmul.f32 %v234_v33, %v218_v25  ;;  %v238_v41 = vmul.f32 %v222_v34, %v222_v34  ;;  %v220_v43 = vmax.f32 %v204_v35, 1e-06 }
  0x4a   :  { %v208_v44 = vmul.f32 %v528_v2, %v728_v13  ;;  %v253_v45 = vmul.f32 %v237_v37, %v221_v30  ;;  %v235_v7 = vmul.f32 %v219_v39, %v219_v39  ;;  %531 = vrsqrt.f32 %v178_v27 }
  0x4b   :  { %v223_v46 = vmax.f32 %v207_v5, 1e-06  ;;  %v265_v47 = vadd.f32 %v250_v40, %v249_v36  ;;  %v254_v48 = vmul.f32 %v238_v41, %v222_v34  ;;  %v236_v50 = vmul.f32 %v220_v43, %v220_v43 }
  0x4c   :  { %v224_v8 = vmax.f32 %v208_v44, 1e-06  ;;  %v251_v51 = vmul.f32 %v235_v7, %v219_v39  ;;  %v180_v54 = vmax.f32 %v144_v23, 1e-24  ;;  %533 = vrsqrt.f32 %v179_v31 }
  0x4d   :  { %v239_v52 = vmul.f32 %v223_v46, %v223_v46  ;;  %266 = vadd.xlane.f32.xlu0 %v265_v47  ;;  %v271_v55 = vadd.f32 %v254_v48, %v253_v45  ;;  %v252_v12 = vmul.f32 %v236_v50, %v220_v43  ;;  %v150_v61 = vadd.f32 %v149_v17, %v148_v57 }
  0x4e   :  { %v240_v56 = vmul.f32 %v224_v8, %v224_v8  ;;  %535 = vrsqrt.f32 %v180_v54  ;;  %v155_v13 = vrot.slane %v154_v10, 1  ;;  %v158_v63 = vadd.f32 %v157_v60, %v764_v49 }
  0x4f   :  { %v255_v62 = vmul.f32 %v239_v52, %v223_v46  ;;  %272 = vadd.xlane.f32.xlu1 %v271_v55  ;;  %v268_v9 = vadd.f32 %v252_v12, %v251_v51  ;;  %v181_v14 = vmax.f32 %v150_v61, 1e-24  ;;  %v163_v15 = vrot.slane %v768_v53, 4 }
  0x50   :  { %v256_v11 = vmul.f32 %v240_v56, %v224_v8  ;;  %v156_v16 = vadd.f32 %v155_v13, %v154_v10  ;;  %v159_v18 = vrot.slane %v158_v63, 2  ;;  %vm395_vm5 = vcmask 1045509  }
  0x51   :  { %269 = vadd.xlane.f32.xlu0 %v268_v9  ;;  %537 = vrsqrt.f32 %v181_v14  ;;  %v164_v21 = vadd.f32 %v163_v15, %v768_v53  ;;  %v337_v9 = vld [vmem:[#allocation5] sm:$0xff]  ;;  %vm397_vm6 = vcmask 1046534   ;;  %vm399_vm7 = vcmask 1047559  }
  0x52   :  { %v530_v19 = vpop.eup %529  ;;  %v274_v20 = vadd.f32 %v256_v11, %v255_v62  ;;  %v182_v17 = vmax.f32 %v156_v16, 1e-24  ;;  %v160_v23 = vadd.f32 %v159_v18, %v158_v63  ;;  %v655_v11 = vmov 0.0  }
  0x53   :  { %v209_v57 = vmul.f32 %v530_v19, %v734_v58  ;;  %v165_v49 = vrot.slane %v164_v21, 2  ;;  %501 = vmatprep.subr.mxu0 %v655_v11  ;;  %503 = vmatprep.mubr.msk.f32.mxu0 %vm656_vm0, %v655_v11  ;;  %vm401_vm8 = vcmask 64512  }
  0x54   :  { %275 = vadd.xlane.f32.xlu1 %v274_v20  ;;  %v532_v60 = vpop.eup %531  ;;  %539 = vrsqrt.f32 %v182_v17  ;;  %v161_v25 = vrot.slane %v160_v23, 1  ;;  %502 = vmatpush3.msra.mxu0 %v337_v9 }
  0x55   :  { %v225_v24 = vmax.f32 %v209_v57, 1e-06  ;;  %v210_v26 = vmul.f32 %v532_v60, %v736_v59  ;;  %v166_v10 = vadd.f32 %v165_v49, %v164_v21 }
  0x56   :  { %v534_v0 = vpop.eup %533  ;;  %v162_v28 = vadd.f32 %v161_v25, %v160_v23 }
  0x57   :  { %v241_v27 = vmul.f32 %v225_v24, %v225_v24  ;;  %v226_v29 = vmax.f32 %v210_v26, 1e-06  ;;  %v211_v30 = vmul.f32 %v534_v0, %v738_v3  ;;  %v167_v53 = vrot.slane %v166_v10, 1 }
  0x58   :  { %v536_v1 = vpop.eup %535  ;;  %v183_v31 = vmax.f32 %v162_v28, 1e-24 }
  0x59   :  { %v257_v58 = vmul.f32 %v241_v27, %v225_v24  ;;  %v242_v32 = vmul.f32 %v226_v29, %v226_v29  ;;  %v212_v33 = vmul.f32 %v536_v1, %v740_v4  ;;  %v227_v34 = vmax.f32 %v211_v30, 1e-06 }
  0x5a   :  { %v168_v35 = vadd.f32 %v167_v53, %v166_v10  ;;  %541 = vrsqrt.f32 %v183_v31 }
  0x5b   :  { %v538_v2 = vpop.eup %537  ;;  %v258_v36 = vmul.f32 %v242_v32, %v226_v29  ;;  %v228_v59 = vmax.f32 %v212_v33, 1e-06  ;;  %v243_v37 = vmul.f32 %v227_v34, %v227_v34 }
  0x5c   :  { %v184_v39 = vmax.f32 %v168_v35, 1e-24  ;;  %v213_v5 = vmul.f32 %v538_v2, %v742_v6 }
  0x5d   :  { %v277_v40 = vadd.f32 %v258_v36, %v257_v58  ;;  %v244_v41 = vmul.f32 %v228_v59, %v228_v59  ;;  %v259_v3 = vmul.f32 %v243_v37, %v227_v34 }
  0x5e   :  { %543 = vrsqrt.f32 %v184_v39  ;;  %v540_v43 = vpop.eup %539  ;;  %v229_v44 = vmax.f32 %v213_v5, 1e-06 }
  0x5f   :  { %278 = vadd.xlane.f32.xlu0 %v277_v40  ;;  %v260_v45 = vmul.f32 %v244_v41, %v228_v59  ;;  %v214_v4 = vmul.f32 %v540_v43, %v748_v22  ;;  %v353_v40 = vlaneseq }
  0x60   :  { %v245_v7 = vmul.f32 %v229_v44, %v229_v44 }
  0x61   :  { %v280_v46 = vadd.f32 %v260_v45, %v259_v3  ;;  %v230_v47 = vmax.f32 %v214_v4, 1e-06  ;;  %v354_v45 = vand.u32 127, %v353_v40  ;;  %v356_v4 = vshrl.u32 %v353_v40, 7 }
  0x62   :  { %v261_v50 = vmul.f32 %v245_v7, %v229_v44 }
  0x63   :  { %281 = vadd.xlane.f32.xlu1 %v280_v46  ;;  %v246_v48 = vmul.f32 %v230_v47, %v230_v47 }
  0x64   :  { %v542_v8 = vpop.eup %541 }
  0x65   :  { %v262_v51 = vmul.f32 %v246_v48, %v230_v47  ;;  %v215_v6 = vmul.f32 %v542_v8, %v758_v38 }
  0x67   :  { %v283_v54 = vadd.f32 %v262_v51, %v261_v50  ;;  %v231_v55 = vmax.f32 %v215_v6, 1e-06  ;;  %v357_v50 = vsub.s32 %v354_v45, %v356_v4 }
  0x68   :  { %v544_v52 = vpop.eup %543 }
  0x69   :  { %v216_v12 = vmul.f32 %v544_v52, %v760_v42  ;;  %284 = vadd.xlane.f32.xlu0 %v283_v54  ;;  %v247_v56 = vmul.f32 %v231_v55, %v231_v55 }
  0x6b   :  { %v232_v61 = vmax.f32 %v216_v12, 1e-06  ;;  %v263_v22 = vmul.f32 %v247_v56, %v231_v55 }
  0x6d   :  { %v248_v62 = vmul.f32 %v232_v61, %v232_v61 }
  0x6f   :  { %v264_v13 = vmul.f32 %v248_v62, %v232_v61 }
  0x71   :  { %v286_v63 = vadd.f32 %v264_v13, %v263_v22 }
  0x73   :  { %287 = vadd.xlane.f32.xlu1 %v286_v63 }
  0xda   :  { %v267_v38 = vpop.xlane.xlu0 %266 }
  0xdb   :  { %v289_v18 = vmul.f32 0.00390625, %v267_v38 }
  0xdc   :  { %v273_v14 = vpop.xlane.xlu1 %272 }
  0xdd   :  { %v291_v19 = vmul.f32 0.00390625, %v273_v14 }
  0xde   :  { %v270_v15 = vpop.xlane.xlu0 %269 }
  0xdf   :  { %v290_v16 = vmul.f32 0.00390625, %v270_v15 }
  0xe1   :  { %v276_v42 = vpop.xlane.xlu1 %275  ;;  %545 = vlog2.f32 %v290_v16 }
  0xe2   :  { %547 = vlog2.f32 %v289_v18  ;;  %v292_v20 = vmul.f32 0.00390625, %v276_v42 }
  0xe3   :  { %549 = vlog2.f32 %v291_v19 }
  0xe4   :  { %551 = vlog2.f32 %v292_v20 }
  0xeb   :  { %v546_v17 = vpop.eup %545 }
  0xec   :  { %v279_v21 = vpop.xlane.xlu0 %278  ;;  %v548_v60 = vpop.eup %547  ;;  %v300_v24 = vmul.f32 0.6931472, %v546_v17 }
  0xed   :  { %v293_v57 = vmul.f32 0.00390625, %v279_v21  ;;  %v550_v25 = vpop.eup %549  ;;  %v298_v26 = vmul.f32 0.6931472, %v548_v60 }
  0xee   :  { %v552_v10 = vpop.eup %551  ;;  %v314_v27 = vmul.f32 0.33333334, %v300_v24  ;;  %v302_v29 = vmul.f32 0.6931472, %v550_v25 }
  0xef   :  { %553 = vlog2.f32 %v293_v57  ;;  %v313_v53 = vmul.f32 0.33333334, %v298_v26  ;;  %v304_v1 = vmul.f32 0.6931472, %v552_v10 }
  0xf0   :  { %v282_v23 = vpop.xlane.xlu1 %281  ;;  %v323_v58 = vmul.f32 1.442695, %v314_v27  ;;  %v315_v31 = vmul.f32 0.33333334, %v302_v29 }
  0xf1   :  { %v294_v49 = vmul.f32 0.00390625, %v282_v23  ;;  %v321_v34 = vmul.f32 1.442695, %v313_v53  ;;  %v316_v35 = vmul.f32 0.33333334, %v304_v1 }
  0xf2   :  { %v325_v59 = vmul.f32 1.442695, %v315_v31  ;;  %v497_v23 = vld [vmem:[%s807_s2] ss:$0 sm:$0xff] }
  0xf3   :  { %555 = vlog2.f32 %v294_v49  ;;  %v327_v5 = vmul.f32 1.442695, %v316_v35 }
  0xf6   :  { %v285_v0 = vpop.xlane.xlu0 %284 }
  0xf7   :  { %v295_v28 = vmul.f32 0.00390625, %v285_v0 }
  0xf9   :  { %v554_v30 = vpop.eup %553  ;;  %557 = vlog2.f32 %v295_v28 }
  0xfa   :  { %v306_v32 = vmul.f32 0.6931472, %v554_v30  ;;  %559 = vpow2.f32 %v323_v58 }
  0xfb   :  { %561 = vpow2.f32 %v321_v34 }
  0xfc   :  { %v317_v37 = vmul.f32 0.33333334, %v306_v32 }
  0xfd   :  { %v556_v33 = vpop.eup %555 }
  0xfe   :  { %v308_v2 = vmul.f32 0.6931472, %v556_v33  ;;  %v329_v43 = vmul.f32 1.442695, %v317_v37 }
 0x100   :  { %v288_v36 = vpop.xlane.xlu1 %287  ;;  %v318_v3 = vmul.f32 0.33333334, %v308_v2 }
 0x101   :  { %v296_v39 = vmul.f32 0.00390625, %v288_v36 }
 0x102   :  { %v331_v46 = vmul.f32 1.442695, %v318_v3 }
 0x103   :  { %563 = vlog2.f32 %v296_v39  ;;  %v558_v41 = vpop.eup %557 }
 0x104   :  { %565 = vpow2.f32 %v325_v59  ;;  %v310_v44 = vmul.f32 0.6931472, %v558_v41  ;;  %v560_v48 = vpop.eup %559 }
 0x105   :  { %567 = vpow2.f32 %v327_v5  ;;  %v562_v8 = vpop.eup %561  ;;  %v362_v6 = vrot.slane %v560_v48, %v357_v50 }
 0x106   :  { %v319_v7 = vmul.f32 0.33333334, %v310_v44  ;;  %569 = vpow2.f32 %v329_v43  ;;  %v358_v55 = vrot.slane %v562_v8, %v357_v50 }
 0x107   :  { %571 = vpow2.f32 %v331_v46 }
 0x108   :  { %v333_v47 = vmul.f32 1.442695, %v319_v7  ;;  %v388_v61 = vsel %vm387_vm1, %v362_v6, %v358_v55 }
 0x10a   :  { %573 = vpow2.f32 %v333_v47 }
 0x10d   :  { %v564_v51 = vpop.eup %563 }
 0x10e   :  { %v312_v52 = vmul.f32 0.6931472, %v564_v51  ;;  %v566_v54 = vpop.eup %565 }
 0x10f   :  { %v568_v12 = vpop.eup %567  ;;  %v366_v62 = vrot.slane %v566_v54, %v357_v50 }
 0x110   :  { %v320_v56 = vmul.f32 0.33333334, %v312_v52  ;;  %v570_v13 = vpop.eup %569  ;;  %v370_v63 = vrot.slane %v568_v12, %v357_v50 }
 0x111   :  { %v390_v9 = vsel %vm389_vm2, %v366_v62, %v388_v61  ;;  %v572_v11 = vpop.eup %571  ;;  %v374_v38 = vrot.slane %v570_v13, %v357_v50 }
 0x112   :  { %v335_v22 = vmul.f32 1.442695, %v320_v56  ;;  %v392_v15 = vsel %vm391_vm3, %v370_v63, %v390_v9  ;;  %v378_v16 = vrot.slane %v572_v11, %v357_v50 }
 0x113   :  { %v394_v42 = vsel %vm393_vm4, %v374_v38, %v392_v15 }
 0x114   :  { %575 = vpow2.f32 %v335_v22  ;;  %v574_v14 = vpop.eup %573  ;;  %v396_v19 = vsel %vm395_vm5, %v378_v16, %v394_v42 }
 0x115   :  { %v382_v18 = vrot.slane %v574_v14, %v357_v50 }
 0x117   :  { %v398_v21 = vsel %vm397_vm6, %v382_v18, %v396_v19 }
 0x11e   :  { %v576_v20 = vpop.eup %575 }
 0x11f   :  { %v386_v57 = vrot.slane %v576_v20, %v357_v50 }
 0x121   :  { %v400_v17 = vsel %vm399_vm7, %v386_v57, %v398_v21 }
 0x122   :  { %504 = vmatmul.mubr.msk.f32.vlgmr.msra.gmra.mrb[0].mxu0 %vm401_vm8, %v400_v17 }
 0x1f5   :  { %v470_v49 = vpop.f32.mrb[0].mxu0 }
 0x1f6   :  { %v471_v60 = vadd.f32 %v497_v23, %v470_v49  ;;  %v505_v24 = vpop.f32.mrb[1].mxu0 }
 0x1f8   :  { %v474_v25 = vmul.f32 %v471_v60, %v471_v60 }
 0x1fa   :  { %475 = vadd.xlane.f32.xlu0 %v474_v25 }
 0x287   :  { %v476_v26 = vpop.xlane.xlu0 %475 }
 0x288   :  { %v477_v10 = vmax.f32 %v476_v26, 1e-24 }
 0x28a   :  { %577 = vrsqrt.f32 %v477_v10 }
 0x294   :  { %v578_v0 = vpop.eup %577 }
 0x295   :  { %v479_v27 = vmul.f32 %v578_v0, %v471_v60 }
 0x297   :  { %480 = vst [vmem:[#allocation7] sm:$0xff] %v479_v27 }
 0x298   :  { %634 = shalt.err (!%p631_p6)
}
 0x299   :  { %s635_s15 = scalar_lea.hbm %s808_s3, 128 }
 0x29a   :  { %p636_p7 = scmp.ne.s32.totalorder %s808_s3, %s635_s15  ;;  %p639_p8 = scmp.lt.u32.totalorder %s635_s15, %s808_s3 }
 0x29c   :  { %p641_p9 = pnand %p639_p8, %p636_p7 }
 0x29e   :  { %644 = shalt.err (!%p641_p9)
}
 0x29f   :  { %490 = dma.vmem_to_hbm [thread:$0]  %s488_s12, 128, %s808_s3, [#allocation4]  }
 0x2a0   :  { %649 = dma.done.wait [#allocation4], 128  }
 0x2a1   :  { %650 = vsyncadd [#allocation4], 4294967168 }
 0x2a2   :  { %494 = vsyncpa [#allocation3], 1 }
 0x2a3   :  { %495 = vsyncpa [#allocation6], 1 }
 0x2a4   :  { %496 = vsyncpa [#allocation4], 1 }

</bundles_post_ra>
